<compile_context>
chip_gen: v7x
topology: tpu7x:2x2x1
jax: 0.10.0
libtpu: 0.0.40
codegen_flags: <defaults>
</compile_context>

<pallas_src>
import jax
import jax.numpy as jnp
from jax.experimental import pallas as pl
from jax.experimental.pallas import tpu as pltpu

IN_DIM = 4      # CartPole state size
HID = 256
OUT_DIM = 2     # number of actions
OUT_PAD = 8     # sublane-padded output rows (only first OUT_DIM are real)
MAX_TB = 2048   # per-tile batch cap (lanes); VMEM use stays at a few MiB


def _round_up(n, m):
    return ((n + m - 1) // m) * m


def dqn_kernel(xT_ref, w1T_ref, b1T_ref, w2T_ref, b2T_ref, o_ref):
    xT = xT_ref[...]          # (4, TB)   f32
    w1T = w1T_ref[...]        # (256, 4)  f32

    # ---- Layer 1: K=4 contraction as 4 VPU outer products ----
    # h[j, b] = sum_k w1[k, j] * x[b, k]
    h = w1T[:, 0:1] * xT[0:1, :]
    h = h + w1T[:, 1:2] * xT[1:2, :]
    h = h + w1T[:, 2:3] * xT[2:3, :]
    h = h + w1T[:, 3:4] * xT[3:4, :]
    h = h + b1T_ref[...]                       # (256, TB) + (256, 1)
    h = jnp.maximum(h, 0.0)

    # ---- Layer 2: (8, 256) @ (256, TB) on the MXU, bf16 in / f32 acc ----
    out = jnp.dot(w2T_ref[...], h.astype(jnp.bfloat16),
                  preferred_element_type=jnp.float32)   # (8, TB) f32
    out = out + b2T_ref[...]                            # + (8, 1)
    o_ref[...] = out.astype(o_ref.dtype)                # lane-dense store


def prepare_params(w1, b1, w2, b2):
    """One-time parameter prep: transpose, pad layer-2 to 8 rows, bf16 cast.

    w1: (4, 256)  b1: (1, 256)  w2: (256, 2)  b2: (1, 2)
    """
    w1T = jnp.asarray(w1, jnp.float32).T                       # (256, 4)
    b1T = jnp.asarray(b1, jnp.float32).reshape(HID, 1)         # (256, 1)
    w2Tp = jnp.zeros((OUT_PAD, HID), jnp.bfloat16)
    w2Tp = w2Tp.at[:OUT_DIM, :].set(
        jnp.asarray(w2, jnp.float32).T.astype(jnp.bfloat16))   # (8, 256) bf16
    b2Tp = jnp.zeros((OUT_PAD, 1), jnp.float32)
    b2Tp = b2Tp.at[:OUT_DIM, :].set(
        jnp.asarray(b2, jnp.float32).reshape(OUT_DIM, 1))      # (8, 1)
    return w1T, b1T, w2Tp, b2Tp


def _choose_tb(B):
    # Batch tile = multiple of 128 lanes, sized from B (no padding cliff),
    # capped at MAX_TB; force >= 2 grid steps once B > 256 for v7x megacore.
    b128 = _round_up(max(B, 1), 128)
    n_tiles = pl.cdiv(b128, MAX_TB)
    if n_tiles == 1 and b128 > 256:
        n_tiles = 2
    return _round_up(pl.cdiv(b128, n_tiles), 128)


def dqn_forward(x, params, *, tb=None):
    """Forward pass matching PyTorch DQN: relu(x @ w1 + b1) @ w2 + b2.

    x: (B, 4) f32.  params: output of prepare_params().  Returns (B, 2) f32.
    """
    w1T, b1T, w2Tp, b2Tp = params
    B = x.shape[0]

    if tb is None:
        tb = _choose_tb(B)
    else:
        tb = _round_up(tb, 128)
    padded_b = _round_up(B, tb)

    # Feature-major input: 4 contiguous padded_b-wide rows.
    xT = jnp.pad(jnp.asarray(x, jnp.float32),
                 ((0, padded_b - B), (0, 0))).T              # (4, padded_b)

    grid = (padded_b // tb,)

    out = pl.pallas_call(
        dqn_kernel,
        out_shape=jax.ShapeDtypeStruct((OUT_PAD, padded_b), jnp.float32),
        grid=grid,
        in_specs=[
            pl.BlockSpec((IN_DIM, tb), lambda i: (0, i)),    # x tile per step
            pl.BlockSpec((HID, IN_DIM), lambda i: (0, 0)),   # weights resident
            pl.BlockSpec((HID, 1), lambda i: (0, 0)),
            pl.BlockSpec((OUT_PAD, HID), lambda i: (0, 0)),
            pl.BlockSpec((OUT_PAD, 1), lambda i: (0, 0)),
        ],
        out_specs=pl.BlockSpec((OUT_PAD, tb), lambda i: (0, i)),
        compiler_params=pltpu.CompilerParams(
            dimension_semantics=("parallel",),
        ),
    )(xT, w1T, b1T, w2Tp, b2Tp)

    return out[:OUT_DIM, :B].T                               # (B, 2)


def init_params(key):
    # Deterministic init mirroring PyTorch nn.Linear default:
    # U(-1/sqrt(fan_in), 1/sqrt(fan_in)) for both weight and bias.
    k1, k2, k3, k4 = jax.random.split(key, 4)
    bound1 = 1.0 / jnp.sqrt(4.0)
    bound2 = 1.0 / jnp.sqrt(256.0)
    w1 = jax.random.uniform(k1, (IN_DIM, HID), jnp.float32, -bound1, bound1)
    b1 = jax.random.uniform(k2, (1, HID), jnp.float32, -bound1, bound1)
    w2 = jax.random.uniform(k3, (HID, OUT_DIM), jnp.float32, -bound2, bound2)
    b2 = jax.random.uniform(k4, (1, OUT_DIM), jnp.float32, -bound2, bound2)
    return w1, b1, w2, b2


if __name__ == "__main__":
    key = jax.random.PRNGKey(0)
    kx, kp = jax.random.split(key)

    # Small batch of CartPole-like 4-dim state vectors.
    B = 8
    x = jax.random.normal(kx, (B, IN_DIM), dtype=jnp.float32)
    w1, b1, w2, b2 = init_params(kp)

    params = prepare_params(w1, b1, w2, b2)   # one-time prep (pad/cast/T)
    out = dqn_forward(x, params)
    out = jax.block_until_ready(out)

    # Reference in plain f32 JAX (same math as the PyTorch forward).
    # Layer-2 uses bf16 MXU operands with f32 accumulation, so agreement is
    # ~1e-2 absolute rather than bit-exact.
    ref = jnp.maximum(x @ w1 + b1, 0.0) @ w2 + b2
    assert out.shape == (B, OUT_DIM)
    assert jnp.allclose(out, ref, atol=2e-2, rtol=2e-2), (out, ref)

    print("KERNEL_OK")
</pallas_src>

<mosaic_0001>
module attributes {stable_mosaic.version = 11 : i64} {
  func.func @dqn_kernel(%arg0: i32, %arg1: memref<4x128xf32, #tpu.memory_space<vmem>>, %arg2: memref<256x4xf32, #tpu.memory_space<vmem>>, %arg3: memref<256x1xf32, #tpu.memory_space<vmem>>, %arg4: memref<8x256xbf16, #tpu.memory_space<vmem>>, %arg5: memref<8x1xf32, #tpu.memory_space<vmem>>, %arg6: memref<8x128xf32, #tpu.memory_space<vmem>>) attributes {dimension_semantics = [#tpu.dimension_semantics<parallel>], iteration_bounds = array<i64: 1>, scalar_prefetch = 0 : i64, scratch_operands = 0 : i64, tpu.core_type = #tpu.core_type<tc>, window_params = [{transform_indices = @transform_0, window_bounds = array<i64: 4, 128>}, {pipeline_mode = #tpu.pipeline_mode<synchronous>, transform_indices = @transform_1, window_bounds = array<i64: 256, 4>}, {pipeline_mode = #tpu.pipeline_mode<synchronous>, transform_indices = @transform_2, window_bounds = array<i64: 256, 1>}, {pipeline_mode = #tpu.pipeline_mode<synchronous>, transform_indices = @transform_3, window_bounds = array<i64: 8, 256>}, {pipeline_mode = #tpu.pipeline_mode<synchronous>, transform_indices = @transform_4, window_bounds = array<i64: 8, 1>}, {transform_indices = @transform_5, window_bounds = array<i64: 8, 128>}]} {
    %c0 = arith.constant 0 : index
    %c0_0 = arith.constant 0 : index
    %0 = vector.load %arg1[%c0, %c0_0] : memref<4x128xf32, #tpu.memory_space<vmem>>, vector<4x128xf32>
    %c0_1 = arith.constant 0 : index
    %c0_2 = arith.constant 0 : index
    %1 = vector.load %arg2[%c0_1, %c0_2] : memref<256x4xf32, #tpu.memory_space<vmem>>, vector<256x4xf32>
    %2 = vector.extract_strided_slice %1 {offsets = [0, 0], sizes = [256, 1], strides = [1, 1]} : vector<256x4xf32> to vector<256x1xf32>
    %3 = vector.extract_strided_slice %0 {offsets = [0, 0], sizes = [1, 128], strides = [1, 1]} : vector<4x128xf32> to vector<1x128xf32>
    %4 = vector.broadcast %2 : vector<256x1xf32> to vector<256x128xf32>
    %5 = vector.broadcast %3 : vector<1x128xf32> to vector<256x128xf32>
    %6 = arith.mulf %4, %5 : vector<256x128xf32>
    %7 = vector.extract_strided_slice %1 {offsets = [0, 1], sizes = [256, 1], strides = [1, 1]} : vector<256x4xf32> to vector<256x1xf32>
    %8 = vector.extract_strided_slice %0 {offsets = [1, 0], sizes = [1, 128], strides = [1, 1]} : vector<4x128xf32> to vector<1x128xf32>
    %9 = vector.broadcast %7 : vector<256x1xf32> to vector<256x128xf32>
    %10 = vector.broadcast %8 : vector<1x128xf32> to vector<256x128xf32>
    %11 = arith.mulf %9, %10 : vector<256x128xf32>
    %12 = arith.addf %6, %11 : vector<256x128xf32>
    %13 = vector.extract_strided_slice %1 {offsets = [0, 2], sizes = [256, 1], strides = [1, 1]} : vector<256x4xf32> to vector<256x1xf32>
    %14 = vector.extract_strided_slice %0 {offsets = [2, 0], sizes = [1, 128], strides = [1, 1]} : vector<4x128xf32> to vector<1x128xf32>
    %15 = vector.broadcast %13 : vector<256x1xf32> to vector<256x128xf32>
    %16 = vector.broadcast %14 : vector<1x128xf32> to vector<256x128xf32>
    %17 = arith.mulf %15, %16 : vector<256x128xf32>
    %18 = arith.addf %12, %17 : vector<256x128xf32>
    %19 = vector.extract_strided_slice %1 {offsets = [0, 3], sizes = [256, 1], strides = [1, 1]} : vector<256x4xf32> to vector<256x1xf32>
    %20 = vector.extract_strided_slice %0 {offsets = [3, 0], sizes = [1, 128], strides = [1, 1]} : vector<4x128xf32> to vector<1x128xf32>
    %21 = vector.broadcast %19 : vector<256x1xf32> to vector<256x128xf32>
    %22 = vector.broadcast %20 : vector<1x128xf32> to vector<256x128xf32>
    %23 = arith.mulf %21, %22 : vector<256x128xf32>
    %24 = arith.addf %18, %23 : vector<256x128xf32>
    %c0_3 = arith.constant 0 : index
    %c0_4 = arith.constant 0 : index
    %25 = vector.load %arg3[%c0_3, %c0_4] : memref<256x1xf32, #tpu.memory_space<vmem>>, vector<256x1xf32>
    %26 = vector.broadcast %25 : vector<256x1xf32> to vector<256x128xf32>
    %27 = arith.addf %24, %26 : vector<256x128xf32>
    %cst = arith.constant 0.000000e+00 : f32
    %28 = vector.broadcast %cst : f32 to vector<256x128xf32>
    %29 = arith.maximumf %27, %28 : vector<256x128xf32>
    %c0_5 = arith.constant 0 : index
    %c0_6 = arith.constant 0 : index
    %30 = vector.load %arg4[%c0_5, %c0_6] : memref<8x256xbf16, #tpu.memory_space<vmem>>, vector<8x256xbf16>
    %31 = arith.truncf %29 : vector<256x128xf32> to vector<256x128xbf16>
    %cst_7 = arith.constant dense<0.000000e+00> : vector<8x128xf32>
    %32 = tpu.matmul %30, %31, %cst_7 {dimension_numbers = #tpu.dot_dimension_numbers<[1], [0], [0], [1], [0, 0, 1, 1], [], []>} : vector<8x256xbf16>, vector<256x128xbf16>, vector<8x128xf32> -> vector<8x128xf32>
    %c0_8 = arith.constant 0 : index
    %c0_9 = arith.constant 0 : index
    %33 = vector.load %arg5[%c0_8, %c0_9] : memref<8x1xf32, #tpu.memory_space<vmem>>, vector<8x1xf32>
    %34 = vector.broadcast %33 : vector<8x1xf32> to vector<8x128xf32>
    %35 = arith.addf %32, %34 : vector<8x128xf32>
    %c0_10 = arith.constant 0 : index
    %c0_11 = arith.constant 0 : index
    %36 = vector.load %arg6[%c0_10, %c0_11] : memref<8x128xf32, #tpu.memory_space<vmem>>, vector<8x128xf32>
    tpu.vector_store %arg6[%c0_10, %c0_11], %35 {strides = array<i32>} : memref<8x128xf32, #tpu.memory_space<vmem>>, vector<8x128xf32>,
    return
  }
  func.func @transform_0(%arg0: i32) -> (i32, i32) {
    %c0_i32 = arith.constant 0 : i32
    %c0_i32_0 = arith.constant 0 : i32
    return %c0_i32, %arg0 : i32, i32
  }
  func.func @transform_1(%arg0: i32) -> (i32, i32) {
    %c0_i32 = arith.constant 0 : i32
    %c0_i32_0 = arith.constant 0 : i32
    %c0_i32_1 = arith.constant 0 : i32
    return %c0_i32, %c0_i32_0 : i32, i32
  }
  func.func @transform_2(%arg0: i32) -> (i32, i32) {
    %c0_i32 = arith.constant 0 : i32
    %c0_i32_0 = arith.constant 0 : i32
    %c0_i32_1 = arith.constant 0 : i32
    return %c0_i32, %c0_i32_0 : i32, i32
  }
  func.func @transform_3(%arg0: i32) -> (i32, i32) {
    %c0_i32 = arith.constant 0 : i32
    %c0_i32_0 = arith.constant 0 : i32
    %c0_i32_1 = arith.constant 0 : i32
    return %c0_i32, %c0_i32_0 : i32, i32
  }
  func.func @transform_4(%arg0: i32) -> (i32, i32) {
    %c0_i32 = arith.constant 0 : i32
    %c0_i32_0 = arith.constant 0 : i32
    %c0_i32_1 = arith.constant 0 : i32
    return %c0_i32, %c0_i32_0 : i32, i32
  }
  func.func @transform_5(%arg0: i32) -> (i32, i32) {
    %c0_i32 = arith.constant 0 : i32
    %c0_i32_0 = arith.constant 0 : i32
    return %c0_i32, %arg0 : i32, i32
  }
}

</mosaic_0001>

<bundles_post_ra>
// kernel: tpu_custom_call.1
= control target key start
LH: loop header
LB: loop body
LE: loop exit
PB: predicated region body
PF: predicated region fallthrough
CT: control target
= control target key end

     0   :  { %v1278_v2 = vmov 1   ;;  %v2250_v3 = vmov 0   ;;  %s2240_s0 = inlined_call_operand.vmem [shape: f32[4,128], index: 0, kind: input, shape index: {}]   ;;  %s2241_s1 = inlined_call_operand.vmem [shape: f32[256,4], index: 1, kind: input, shape index: {}]   ;;  %s2242_s2 = inlined_call_operand.vmem [shape: f32[256,1], index: 2, kind: input, shape index: {}]   ;;  %s2243_s3 = inlined_call_operand.vmem [shape: bf16[8,256], index: 3, kind: input, shape index: {}]   ;;  %s2244_s4 = inlined_call_operand.vmem [shape: f32[8,1], index: 4, kind: input, shape index: {}]   ;;  %s2245_s5 = inlined_call_operand.hbm [shape: f32[8,128], index: 5, kind: output, shape index: {}]  }
   0x1   :  { %v1316_v0 = vld [vmem:[%s2241_s1 + $0x10] sm:$0xff]  ;;  %v1321_v1 = vld [vmem:[%s2241_s1] sm:$0xff]  ;;  %1210 = vset.pattern.permute.xlu0 %v1278_v2  ;;  %1209 = vset.pattern.permute.xlu1 %v2250_v3  ;;  %v1329_v4 = vld [vmem:[%s2241_s1 + $0x18] sm:$0xff] }
   0x2   :  { %67 = vperm.xlu1 %1209, %v1316_v0   ;;  %252 = vperm.xlu0 %1210, %v1321_v1   ;;  %v1336_v5 = vld [vmem:[%s2241_s1 + $0x28] sm:$0xff]  ;;  %v1343_v6 = vld [vmem:[%s2241_s1 + $0x38] sm:$0xff] }
   0x6   :  { %72 = vperm.xlu1 %1209, %v1329_v4   ;;  %264 = vperm.xlu0 %1210, %v1329_v4  }
   0xa   :  { %82 = vperm.xlu1 %1209, %v1336_v5   ;;  %272 = vperm.xlu0 %1210, %v1336_v5  }
   0xb   :  { %10 = vsyncpa [#allocation3], 0  ;;  %v1350_v7 = vld [vmem:[%s2241_s1 + $0x48] sm:$0xff]  ;;  %v1357_v8 = vld [vmem:[%s2241_s1 + $0x58] sm:$0xff]  ;;  %v2246_v20 = vmov 2   ;;  %v2248_v35 = vmov 3  }
   0xc   :  { %v1364_v9 = vld [vmem:[%s2241_s1 + $0x68] sm:$0xff]  ;;  %v1371_v10 = vld [vmem:[%s2241_s1 + $0x78] sm:$0xff]  ;;  %v1442_v21 = vld [vmem:[%s2241_s1 + $0x20] sm:$0xff] }
   0xd   :  { %v1378_v11 = vld [vmem:[%s2241_s1 + $0x88] sm:$0xff]  ;;  %v1385_v12 = vld [vmem:[%s2241_s1 + $0x98] sm:$0xff]  ;;  %v1449_v22 = vld [vmem:[%s2241_s1 + $0x30] sm:$0xff] }
   0xe   :  { %92 = vperm.xlu1 %1209, %v1343_v6   ;;  %280 = vperm.xlu0 %1210, %v1343_v6   ;;  %v1392_v13 = vld [vmem:[%s2241_s1 + $0xa8] sm:$0xff]  ;;  %v1399_v14 = vld [vmem:[%s2241_s1 + $0xb8] sm:$0xff]  ;;  %v1456_v23 = vld [vmem:[%s2241_s1 + $0x40] sm:$0xff] }
   0xf   :  { %v1406_v15 = vld [vmem:[%s2241_s1 + $0xc8] sm:$0xff]  ;;  %v1413_v16 = vld [vmem:[%s2241_s1 + $0xd8] sm:$0xff]  ;;  %v1463_v24 = vld [vmem:[%s2241_s1 + $0x50] sm:$0xff] }
  0x10   :  { %v1420_v17 = vld [vmem:[%s2241_s1 + $0xe8] sm:$0xff]  ;;  %v1427_v18 = vld [vmem:[%s2241_s1 + $0xf8] sm:$0xff]  ;;  %v1470_v25 = vld [vmem:[%s2241_s1 + $0x60] sm:$0xff] }
  0x11   :  { %2256 = vst [vmem:[#allocation5_spill] sm:$0xff] %v1427_v18  ;;  %v1434_v19 = vld [vmem:[%s2241_s1 + $0x8] sm:$0xff]  ;;  %v1477_v26 = vld [vmem:[%s2241_s1 + $0x70] sm:$0xff]  ;;  %v1484_v27 = vld [vmem:[%s2241_s1 + $0x80] sm:$0xff] }
  0x12   :  { %102 = vperm.xlu1 %1209, %v1350_v7   ;;  %288 = vperm.xlu0 %1210, %v1350_v7   ;;  %2257 = vst [vmem:[#allocation6_spill] sm:$0xff] %v1477_v26  ;;  %v1493_v28 = vld [vmem:[%s2241_s1 + $0x90] sm:$0xff]  ;;  %v1498_v29 = vld [vmem:[%s2241_s1 + $0xa0] sm:$0xff] }
  0x13   :  { %v1507_v30 = vld [vmem:[%s2241_s1 + $0xb0] sm:$0xff]  ;;  %v1512_v31 = vld [vmem:[%s2241_s1 + $0xc0] sm:$0xff] }
  0x14   :  { %v1521_v32 = vld [vmem:[%s2241_s1 + $0xd0] sm:$0xff]  ;;  %v1526_v33 = vld [vmem:[%s2241_s1 + $0xe0] sm:$0xff] }
  0x15   :  { %v1535_v34 = vld [vmem:[%s2241_s1 + $0xf0] sm:$0xff] }
  0x16   :  { %112 = vperm.xlu1 %1209, %v1357_v8   ;;  %296 = vperm.xlu0 %1210, %v1357_v8   ;;  %2258 = vst [vmem:[#allocation7_spill] sm:$0xff] %v1535_v34 }
  0x1a   :  { %122 = vperm.xlu1 %1209, %v1364_v9   ;;  %304 = vperm.xlu0 %1210, %v1364_v9  }
  0x1e   :  { %132 = vperm.xlu1 %1209, %v1371_v10   ;;  %312 = vperm.xlu0 %1210, %v1371_v10  }
  0x22   :  { %142 = vperm.xlu1 %1209, %v1378_v11   ;;  %320 = vperm.xlu0 %1210, %v1378_v11  }
  0x26   :  { %152 = vperm.xlu1 %1209, %v1385_v12   ;;  %328 = vperm.xlu0 %1210, %v1385_v12  }
  0x2a   :  { %162 = vperm.xlu1 %1209, %v1392_v13   ;;  %336 = vperm.xlu0 %1210, %v1392_v13  }
  0x2e   :  { %172 = vperm.xlu1 %1209, %v1399_v14   ;;  %344 = vperm.xlu0 %1210, %v1399_v14  }
  0x32   :  { %182 = vperm.xlu1 %1209, %v1406_v15   ;;  %352 = vperm.xlu0 %1210, %v1406_v15  }
  0x36   :  { %192 = vperm.xlu1 %1209, %v1413_v16   ;;  %360 = vperm.xlu0 %1210, %v1413_v16  }
  0x3a   :  { %202 = vperm.xlu1 %1209, %v1420_v17   ;;  %368 = vperm.xlu0 %1210, %v1420_v17  }
  0x3e   :  { %212 = vperm.xlu1 %1209, %v1427_v18   ;;  %376 = vperm.xlu0 %1210, %v1427_v18  }
  0x42   :  { %1211 = vset.pattern.permute.xlu1 %v1278_v2  ;;  %1213 = vset.pattern.permute.xlu0 %v2246_v20 }
  0x43   :  { %256 = vperm.xlu1 %1211, %v1434_v19   ;;  %452 = vperm.xlu0 %1213, %v1434_v19  }
  0x47   :  { %260 = vperm.xlu1 %1211, %v1316_v0   ;;  %464 = vperm.xlu0 %1213, %v1442_v21  }
  0x4b   :  { %268 = vperm.xlu1 %1211, %v1442_v21   ;;  %472 = vperm.xlu0 %1213, %v1449_v22  }
  0x4f   :  { %276 = vperm.xlu1 %1211, %v1449_v22   ;;  %480 = vperm.xlu0 %1213, %v1456_v23  }
  0x53   :  { %284 = vperm.xlu1 %1211, %v1456_v23   ;;  %488 = vperm.xlu0 %1213, %v1463_v24  }
  0x57   :  { %292 = vperm.xlu1 %1211, %v1463_v24   ;;  %496 = vperm.xlu0 %1213, %v1470_v25  }
  0x5b   :  { %300 = vperm.xlu1 %1211, %v1470_v25   ;;  %504 = vperm.xlu0 %1213, %v1477_v26  }
  0x5f   :  { %308 = vperm.xlu1 %1211, %v1477_v26   ;;  %512 = vperm.xlu0 %1213, %v1484_v27  }
  0x63   :  { %316 = vperm.xlu1 %1211, %v1484_v27   ;;  %524 = vperm.xlu0 %1213, %v1385_v12  }
  0x67   :  { %324 = vperm.xlu1 %1211, %v1493_v28   ;;  %528 = vperm.xlu0 %1213, %v1498_v29  }
  0x6b   :  { %332 = vperm.xlu1 %1211, %v1498_v29   ;;  %540 = vperm.xlu0 %1213, %v1399_v14  }
  0x6f   :  { %340 = vperm.xlu1 %1211, %v1507_v30   ;;  %544 = vperm.xlu0 %1213, %v1512_v31  }
  0x73   :  { %348 = vperm.xlu1 %1211, %v1512_v31   ;;  %556 = vperm.xlu0 %1213, %v1413_v16  }
  0x77   :  { %356 = vperm.xlu1 %1211, %v1521_v32   ;;  %560 = vperm.xlu0 %1213, %v1526_v33  }
  0x7b   :  { %364 = vperm.xlu1 %1211, %v1526_v33   ;;  %572 = vperm.xlu0 %1213, %v1427_v18  }
  0x7f   :  { %372 = vperm.xlu1 %1211, %v1535_v34   ;;  %1246 = vset.pattern.permute.xlu0 %v2248_v35 }
  0x80   :  { %708 = vperm.xlu0 %1246, %v1484_v27  }
  0x81   :  { %v1540_v36 = vpop.permute.xlu1 %67  ;;  %v1542_v37 = vpop.permute.xlu0 %252 }
  0x83   :  { %1212 = vset.pattern.permute.xlu1 %v2246_v20 }
  0x84   :  { %448 = vperm.xlu1 %1212, %v1321_v1   ;;  %648 = vperm.xlu0 %1246, %v1434_v19  }
  0x85   :  { %v1547_v38 = vpop.permute.xlu1 %72  ;;  %v1549_v39 = vpop.permute.xlu0 %264 }
  0x88   :  { %456 = vperm.xlu1 %1212, %v1316_v0   ;;  %656 = vperm.xlu0 %1246, %v1329_v4  }
  0x89   :  { %v1553_v40 = vpop.permute.xlu1 %82  ;;  %v1555_v41 = vpop.permute.xlu0 %272 }
  0x8a   :  { %2259 = vst [vmem:[#allocation8_spill] sm:$0xff] %v1553_v40  ;;  %2260 = vst [vmem:[#allocation9_spill] sm:$0xff] %v1555_v41 }
  0x8c   :  { %460 = vperm.xlu1 %1212, %v1329_v4   ;;  %728 = vperm.xlu0 %1246, %v1392_v13  }
  0x8d   :  { %v1559_v42 = vpop.permute.xlu1 %92  ;;  %v1561_v43 = vpop.permute.xlu0 %280 }
  0x8e   :  { %2261 = vst [vmem:[#allocation10_spill] sm:$0xff] %v1559_v42  ;;  %2262 = vst [vmem:[#allocation11_spill] sm:$0xff] %v1561_v43  ;;  %v863_v43 = vld [vmem:[%s2242_s2 + $0xc0] sm:$0xff] }
  0x90   :  { %468 = vperm.xlu1 %1212, %v1336_v5   ;;  %660 = vperm.xlu0 %1246, %v1442_v21  }
  0x91   :  { %v1565_v44 = vpop.permute.xlu1 %102  ;;  %v1567_v45 = vpop.permute.xlu0 %288 }
  0x92   :  { %2263 = vst [vmem:[#allocation12_spill] sm:$0xff] %v1565_v44  ;;  %2264 = vst [vmem:[#allocation13_spill] sm:$0xff] %v1567_v45  ;;  %v855_v45 = vld [vmem:[%s2242_s2 + $0x80] sm:$0xff] }
  0x94   :  { %476 = vperm.xlu1 %1212, %v1343_v6   ;;  %672 = vperm.xlu0 %1246, %v1343_v6  }
  0x95   :  { %v1571_v46 = vpop.permute.xlu1 %112  ;;  %v1573_v47 = vpop.permute.xlu0 %296 }
  0x96   :  { %2265 = vst [vmem:[#allocation14_spill] sm:$0xff] %v1571_v46  ;;  %2266 = vst [vmem:[#allocation15_spill] sm:$0xff] %v1573_v47 }
  0x98   :  { %484 = vperm.xlu1 %1212, %v1350_v7   ;;  %744 = vperm.xlu0 %1246, %v1406_v15  }
  0x99   :  { %v1577_v48 = vpop.permute.xlu1 %122  ;;  %v1579_v49 = vpop.permute.xlu0 %304 }
  0x9a   :  { %2267 = vst [vmem:[#allocation16_spill] sm:$0xff] %v1577_v48  ;;  %2268 = vst [vmem:[#allocation17_spill] sm:$0xff] %v1579_v49  ;;  %v2287_v49 = vmov 0  }
  0x9c   :  { %492 = vperm.xlu1 %1212, %v1357_v8   ;;  %676 = vperm.xlu0 %1246, %v1456_v23  }
  0x9d   :  { %v1583_v50 = vpop.permute.xlu1 %132  ;;  %v1585_v51 = vpop.permute.xlu0 %312 }
  0x9e   :  { %2269 = vst [vmem:[#allocation18_spill] sm:$0xff] %v1583_v50  ;;  %2270 = vst [vmem:[#allocation19_spill] sm:$0xff] %v1585_v51  ;;  %v2285_v50 = vmov 2  }
  0xa0   :  { %500 = vperm.xlu1 %1212, %v1364_v9   ;;  %688 = vperm.xlu0 %1246, %v1357_v8   ;;  %v856_v8 = vld [vmem:[%s2242_s2 + $0x88] sm:$0xff] }
  0xa1   :  { %v1589_v52 = vpop.permute.xlu1 %142  ;;  %v1591_v53 = vpop.permute.xlu0 %320 }
  0xa4   :  { %508 = vperm.xlu1 %1212, %v1371_v10   ;;  %760 = vperm.xlu0 %1246, %v1420_v17  }
  0xa5   :  { %v1595_v54 = vpop.permute.xlu1 %152  ;;  %v1597_v55 = vpop.permute.xlu0 %328 }
  0xa8   :  { %516 = vperm.xlu1 %1212, %v1378_v11   ;;  %692 = vperm.xlu0 %1246, %v1470_v25  }
  0xa9   :  { %v1601_v56 = vpop.permute.xlu1 %162  ;;  %v1603_v57 = vpop.permute.xlu0 %336 }
  0xaa   :  { %2271 = vst [vmem:[#allocation20_spill] sm:$0xff] %v1601_v56  ;;  %2272 = vst [vmem:[#allocation21_spill] sm:$0xff] %v1603_v57 }
  0xac   :  { %1214 = vset.pattern.permute.xlu1 %v2248_v35  ;;  %704 = vperm.xlu0 %1246, %v1371_v10  }
  0xad   :  { %v1607_v58 = vpop.permute.xlu1 %172  ;;  %712 = vperm.xlu1 %1214, %v1378_v11   ;;  %v1610_v59 = vpop.permute.xlu0 %344 }
  0xae   :  { %2273 = vst [vmem:[#allocation22_spill] sm:$0xff] %v1607_v58  ;;  %2274 = vst [vmem:[#allocation23_spill] sm:$0xff] %v1610_v59 }
  0xb0   :  { %1250 = vset.pattern.permute.xlu0 %v2250_v3 }
  0xb1   :  { %v1613_v60 = vpop.permute.xlu1 %182  ;;  %644 = vperm.xlu1 %1214, %v1321_v1   ;;  %57 = vperm.xlu0 %1250, %v1321_v1   ;;  %v1617_v61 = vpop.permute.xlu0 %352 }
  0xb2   :  { %2275 = vst [vmem:[#allocation24_spill] sm:$0xff] %v1613_v60  ;;  %2276 = vst [vmem:[#allocation25_spill] sm:$0xff] %v1617_v61  ;;  %v841_v61 = vld [vmem:[%s2242_s2 + $0x10] sm:$0xff] }
  0xb5   :  { %v1619_v62 = vpop.permute.xlu1 %192  ;;  %1215 = vset.pattern.permute.xlu1 %v2246_v20  ;;  %62 = vperm.xlu0 %1250, %v1434_v19   ;;  %v1623_v63 = vpop.permute.xlu0 %360 }
  0xb6   :  { %2277 = vst [vmem:[#allocation26_spill] sm:$0xff] %v1619_v62  ;;  %2278 = vst [vmem:[#allocation27_spill] sm:$0xff] %v1623_v63  ;;  %520 = vperm.xlu1 %1215, %v1493_v28  }
  0xb9   :  { %v1626_v2 = vpop.permute.xlu1 %202  ;;  %77 = vperm.xlu0 %1250, %v1442_v21   ;;  %v1629_v4 = vpop.permute.xlu0 %368 }
  0xba   :  { %2279 = vst [vmem:[#allocation28_spill] sm:$0xff] %v1626_v2  ;;  %2280 = vst [vmem:[#allocation29_spill] sm:$0xff] %v1629_v4  ;;  %1216 = vset.pattern.permute.xlu1 %v2248_v35 }
  0xbb   :  { %716 = vperm.xlu1 %1216, %v1493_v28  }
  0xbd   :  { %v1633_v1 = vpop.permute.xlu1 %212  ;;  %87 = vperm.xlu0 %1250, %v1449_v22   ;;  %v1636_v6 = vpop.permute.xlu0 %376 }
  0xbe   :  { %2281 = vst [vmem:[#allocation30_spill] sm:$0xff] %v1633_v1  ;;  %2282 = vst [vmem:[#allocation31_spill] sm:$0xff] %v1636_v6  ;;  %v2286_v1 = vmov 3  }
  0xbf   :  { %720 = vperm.xlu1 %1216, %v1385_v12  }
  0xc1   :  { %97 = vperm.xlu0 %1250, %v1456_v23  }
  0xc2   :  { %v1643_v10 = vpop.permute.xlu1 %256  ;;  %v1645_v11 = vpop.permute.xlu0 %452 }
  0xc3   :  { %1217 = vset.pattern.permute.xlu1 %v2250_v3 }
  0xc4   :  { %958 = vperm.xlu1 %1217, %v856_v8   ;;  %v839_v8 = vld [vmem:[%s2242_s2] sm:$0xff] }
  0xc5   :  { %107 = vperm.xlu0 %1250, %v1463_v24  }
  0xc6   :  { %v1649_v19 = vpop.permute.xlu1 %260  ;;  %v1651_v21 = vpop.permute.xlu0 %464 }
  0xc8   :  { %1218 = vset.pattern.permute.xlu1 %v2248_v35 }
  0xc9   :  { %652 = vperm.xlu1 %1218, %v1316_v0   ;;  %117 = vperm.xlu0 %1250, %v1470_v25   ;;  %v840_v0 = vld [vmem:[%s2242_s2 + $0x8] sm:$0xff] }
  0xca   :  { %v1656_v12 = vpop.permute.xlu1 %268  ;;  %v1658_v23 = vpop.permute.xlu0 %472 }
  0xcb   :  { %2283 = vst [vmem:[#allocation32_spill] sm:$0xff] %v1658_v23 }
  0xcd   :  { %1219 = vset.pattern.permute.xlu1 %v2250_v3  ;;  %127 = vperm.xlu0 %1250, %v1477_v26  }
  0xce   :  { %v1665_v20 = vpop.permute.xlu1 %276  ;;  %873 = vperm.xlu1 %1219, %v839_v8   ;;  %v1667_v35 = vpop.permute.xlu0 %480 }
  0xcf   :  { %2284 = vst [vmem:[#allocation33_spill] sm:$0xff] %v1665_v20 }
  0xd1   :  { %137 = vperm.xlu0 %1250, %v1484_v27  }
  0xd2   :  { %v1673_v25 = vpop.permute.xlu1 %284  ;;  %878 = vperm.xlu1 %1219, %v840_v0   ;;  %v1675_v51 = vpop.permute.xlu0 %488 }
  0xd5   :  { %147 = vperm.xlu0 %1250, %v1493_v28  }
  0xd6   :  { %v1678_v3 = vpop.permute.xlu1 %292  ;;  %1220 = vset.pattern.permute.xlu1 %v2285_v50  ;;  %v1681_v8 = vpop.permute.xlu0 %496 }
  0xd7   :  { %532 = vperm.xlu1 %1220, %v1392_v13   ;;  %v857_v13 = vld [vmem:[%s2242_s2 + $0x90] sm:$0xff] }
  0xd9   :  { %157 = vperm.xlu0 %1250, %v1498_v29  }
  0xda   :  { %v1685_v6 = vpop.permute.xlu1 %300  ;;  %v1687_v27 = vpop.permute.xlu0 %504 }
  0xdb   :  { %1221 = vset.pattern.permute.xlu1 %v2286_v1 }
  0xdc   :  { %724 = vperm.xlu1 %1221, %v1498_v29   ;;  %v858_v29 = vld [vmem:[%s2242_s2 + $0x98] sm:$0xff] }
  0xdd   :  { %167 = vperm.xlu0 %1250, %v1507_v30  }
  0xde   :  { %v1692_v28 = vpop.permute.xlu1 %308  ;;  %v1694_v0 = vpop.permute.xlu0 %512 }
  0xe0   :  { %1222 = vset.pattern.permute.xlu1 %v2287_v49 }
  0xe1   :  { %963 = vperm.xlu1 %1222, %v857_v13   ;;  %177 = vperm.xlu0 %1250, %v1512_v31  }
  0xe2   :  { %v1701_v48 = vpop.permute.xlu1 %316  ;;  %v1703_v4 = vpop.permute.xlu0 %524 }
  0xe5   :  { %968 = vperm.xlu1 %1222, %v858_v29   ;;  %187 = vperm.xlu0 %1250, %v1521_v32   ;;  %v842_v29 = vld [vmem:[%s2242_s2 + $0x18] sm:$0xff] }
  0xe6   :  { %v1709_v2 = vpop.permute.xlu1 %324  ;;  %v1711_v47 = vpop.permute.xlu0 %528 }
  0xe7   :  { %2288 = vst [vmem:[#allocation34_spill] sm:$0xff] %v1711_v47 }
  0xe9   :  { %1223 = vset.pattern.permute.xlu1 %v2286_v1  ;;  %197 = vperm.xlu0 %1250, %v1526_v33  }
  0xea   :  { %v1715_v13 = vpop.permute.xlu1 %332  ;;  %664 = vperm.xlu1 %1223, %v1336_v5   ;;  %v1718_v46 = vpop.permute.xlu0 %540 }
  0xeb   :  { %2289 = vst [vmem:[#allocation35_spill] sm:$0xff] %v1715_v13  ;;  %2290 = vst [vmem:[#allocation36_spill] sm:$0xff] %v1718_v46 }
  0xed   :  { %207 = vperm.xlu0 %1250, %v1535_v34  }
  0xee   :  { %v1724_v63 = vpop.permute.xlu1 %340  ;;  %1224 = vset.pattern.permute.xlu1 %v2287_v49  ;;  %v1727_v62 = vpop.permute.xlu0 %544 }
  0xef   :  { %2291 = vst [vmem:[#allocation37_spill] sm:$0xff] %v1724_v63  ;;  %888 = vperm.xlu1 %1224, %v842_v29  }
  0xf1   :  { %953 = vperm.xlu0 %1250, %v855_v45   ;;  %v859_v45 = vld [vmem:[%s2242_s2 + $0xa0] sm:$0xff] }
  0xf2   :  { %v1732_v5 = vpop.permute.xlu1 %348  ;;  %v1734_v44 = vpop.permute.xlu0 %556 }
  0xf3   :  { %2292 = vst [vmem:[#allocation38_spill] sm:$0xff] %v1734_v44  ;;  %1225 = vset.pattern.permute.xlu1 %v2285_v50 }
  0xf4   :  { %536 = vperm.xlu1 %1225, %v1507_v30  }
  0xf5   :  { %883 = vperm.xlu0 %1250, %v841_v61   ;;  %v845_v61 = vld [vmem:[%s2242_s2 + $0x30] sm:$0xff] }
  0xf6   :  { %v1741_v60 = vpop.permute.xlu1 %356  ;;  %v1743_v23 = vpop.permute.xlu0 %560 }
  0xf7   :  { %2293 = vst [vmem:[#allocation39_spill] sm:$0xff] %v1741_v60  ;;  %2294 = vst [vmem:[#allocation40_spill] sm:$0xff] %v1743_v23 }
  0xf8   :  { %1226 = vset.pattern.permute.xlu1 %v2286_v1 }
  0xf9   :  { %732 = vperm.xlu1 %1226, %v1507_v30   ;;  %973 = vperm.xlu0 %1250, %v859_v45   ;;  %v860_v30 = vld [vmem:[%s2242_s2 + $0xa8] sm:$0xff] }
  0xfa   :  { %v1750_v29 = vpop.permute.xlu1 %364  ;;  %v1752_v44 = vpop.permute.xlu0 %572 }
  0xfb   :  { %2295 = vst [vmem:[#allocation41_spill] sm:$0xff] %v1752_v44  ;;  %v867_v44 = vld [vmem:[%s2242_s2 + $0xe0] sm:$0xff] }
  0xfd   :  { %736 = vperm.xlu1 %1226, %v1399_v14   ;;  %903 = vperm.xlu0 %1250, %v845_v61   ;;  %v849_v14 = vld [vmem:[%s2242_s2 + $0x50] sm:$0xff] }
  0xfe   :  { %v1758_v60 = vpop.permute.xlu1 %372 }
  0xff   :  { %2296 = vst [vmem:[#allocation42_spill] sm:$0xff] %v1758_v60  ;;  %v1763_v42 = vpop.permute.xlu0 %708 }
 0x101   :  { %1227 = vset.pattern.permute.xlu1 %v2287_v49  ;;  %993 = vperm.xlu0 %1250, %v863_v43  }
 0x102   :  { %978 = vperm.xlu1 %1227, %v860_v30   ;;  %v843_v30 = vld [vmem:[%s2242_s2 + $0x20] sm:$0xff] }
 0x103   :  { %v1772_v45 = vpop.permute.xlu1 %448  ;;  %v1774_v61 = vpop.permute.xlu0 %648 }
 0x105   :  { %923 = vperm.xlu0 %1250, %v849_v14   ;;  %v869_v14 = vld [vmem:[%s2242_s2 + $0xf0] sm:$0xff] }
 0x106   :  { %1228 = vset.pattern.permute.xlu1 %v2286_v1 }
 0x107   :  { %668 = vperm.xlu1 %1228, %v1449_v22   ;;  %v1781_v60 = vpop.permute.xlu1 %456  ;;  %v1783_v43 = vpop.permute.xlu0 %656  ;;  %v844_v22 = vld [vmem:[%s2242_s2 + $0x28] sm:$0xff] }
 0x108   :  { %2297 = vst [vmem:[#allocation43_spill] sm:$0xff] %v1781_v60  ;;  %2298 = vst [vmem:[#allocation44_spill] sm:$0xff] %v1783_v43 }
 0x109   :  { %1013 = vperm.xlu0 %1250, %v867_v44   ;;  %v854_v44 = vld [vmem:[%s2242_s2 + $0x78] sm:$0xff] }
 0x10b   :  { %1229 = vset.pattern.permute.xlu1 %v2287_v49  ;;  %v1792_v20 = vpop.permute.xlu1 %460  ;;  %v1794_v46 = vpop.permute.xlu0 %728 }
 0x10c   :  { %2299 = vst [vmem:[#allocation45_spill] sm:$0xff] %v1794_v46  ;;  %893 = vperm.xlu1 %1229, %v843_v30  }
 0x10d   :  { %1023 = vperm.xlu0 %1250, %v869_v14  }
 0x10f   :  { %v1802_v63 = vpop.permute.xlu1 %468  ;;  %v661_v59 = vpop.permute.xlu0 %660 }
 0x110   :  { %2300 = vst [vmem:[#allocation46_spill] sm:$0xff] %v1802_v63  ;;  %898 = vperm.xlu1 %1229, %v844_v22  }
 0x111   :  { %948 = vperm.xlu0 %1250, %v854_v44   ;;  %v861_v44 = vld [vmem:[%s2242_s2 + $0xb0] sm:$0xff] }
 0x113   :  { %v1804_v58 = vpop.permute.xlu1 %476  ;;  %v1806_v41 = vpop.permute.xlu0 %672 }
 0x114   :  { %2301 = vst [vmem:[#allocation47_spill] sm:$0xff] %v1804_v58  ;;  %2302 = vst [vmem:[#allocation48_spill] sm:$0xff] %v1806_v41  ;;  %1230 = vset.pattern.permute.xlu1 %v2285_v50 }
 0x115   :  { %548 = vperm.xlu1 %1230, %v1406_v15  }
 0x117   :  { %v1810_v30 = vpop.permute.xlu1 %484  ;;  %v1812_v14 = vpop.permute.xlu0 %744 }
 0x118   :  { %2303 = vst [vmem:[#allocation49_spill] sm:$0xff] %v1810_v30  ;;  %2304 = vst [vmem:[#allocation50_spill] sm:$0xff] %v1812_v14  ;;  %v862_v30 = vld [vmem:[%s2242_s2 + $0xb8] sm:$0xff] }
 0x119   :  { %1231 = vset.pattern.permute.xlu1 %v2286_v1 }
 0x11a   :  { %740 = vperm.xlu1 %1231, %v1512_v31  }
 0x11b   :  { %v1816_v63 = vpop.permute.xlu1 %492  ;;  %v677_v22 = vpop.permute.xlu0 %676 }
 0x11c   :  { %2305 = vst [vmem:[#allocation51_spill] sm:$0xff] %v1816_v63 }
 0x11e   :  { %1232 = vset.pattern.permute.xlu1 %v2287_v49 }
 0x11f   :  { %983 = vperm.xlu1 %1232, %v861_v44   ;;  %v1822_v41 = vpop.permute.xlu1 %500  ;;  %v1824_v15 = vpop.permute.xlu0 %688  ;;  %v846_v44 = vld [vmem:[%s2242_s2 + $0x38] sm:$0xff] }
 0x120   :  { %2306 = vst [vmem:[#allocation52_spill] sm:$0xff] %v1822_v41  ;;  %2307 = vst [vmem:[#allocation53_spill] sm:$0xff] %v1824_v15  ;;  %v215_v41 = vlaneseq }
 0x123   :  { %988 = vperm.xlu1 %1232, %v862_v30   ;;  %v1829_v31 = vpop.permute.xlu1 %508  ;;  %v1831_v63 = vpop.permute.xlu0 %760 }
 0x124   :  { %2308 = vst [vmem:[#allocation54_spill] sm:$0xff] %v1829_v31  ;;  %2309 = vst [vmem:[#allocation55_spill] sm:$0xff] %v1831_v63  ;;  %v216_v31 = vshrl.u32 %v215_v41, 7 }
 0x126   :  { %v381_v26 = vsub.s32 1, %v216_v31  ;;  %v577_v46 = vsub.s32 2, %v216_v31  ;;  %v773_v47 = vsub.s32 3, %v216_v31 }
 0x127   :  { %1233 = vset.pattern.permute.xlu1 %v2286_v1  ;;  %v1834_v14 = vpop.permute.xlu1 %516  ;;  %v1836_v58 = vpop.permute.xlu0 %692 }
 0x128   :  { %680 = vperm.xlu1 %1233, %v1350_v7   ;;  %v217_v7 = vsub.s32 0, %v216_v31 }
 0x12b   :  { %v1842_v15 = vpop.permute.xlu0 %704 }
 0x12c   :  { %2310 = vst [vmem:[#allocation56_spill] sm:$0xff] %v1842_v15  ;;  %1234 = vset.pattern.permute.xlu1 %v2287_v49  ;;  %v1845_v30 = vpop.permute.xlu1 %712  ;;  %v22_v15 = vld [vmem:[%s2240_s0] sm:$0xf] }
 0x12d   :  { %908 = vperm.xlu1 %1234, %v846_v44   ;;  %v1861_v41 = vrot.slane %v22_v15, %v217_v7  ;;  %v1863_v57 = vrot.slane %v22_v15, %v381_v26  ;;  %v1865_v56 = vrot.slane %v22_v15, %v577_v46  ;;  %v1872_v31 = vrot.slane %v22_v15, %v773_v47 }
 0x12f   :  { %v583_v34 = vmul.f32 %v1865_v56, %v1651_v21  ;;  %v779_v26 = vmul.f32 %v1872_v31, %v661_v59  ;;  %v587_v59 = vmul.f32 %v1865_v56, %v1667_v35 }
 0x130   :  { %v1847_v63 = vpop.permute.xlu1 %644  ;;  %v1849_v40 = vpop.permute.xlu0 %57 }
 0x131   :  { %2311 = vst [vmem:[#allocation57_spill] sm:$0xff] %v1847_v63  ;;  %1235 = vset.pattern.permute.xlu1 %v2285_v50  ;;  %v387_v63 = vmul.f32 %v1863_v57, %v1656_v12 }
 0x132   :  { %552 = vperm.xlu1 %1235, %v1521_v32  }
 0x134   :  { %v1856_v18 = vpop.permute.xlu0 %62 }
 0x135   :  { %v1858_v44 = vpop.permute.xlu1 %520 }
 0x136   :  { %1236 = vset.pattern.permute.xlu1 %v2286_v1 }
 0x137   :  { %748 = vperm.xlu1 %1236, %v1521_v32   ;;  %v864_v32 = vld [vmem:[%s2242_s2 + $0xc8] sm:$0xff] }
 0x138   :  { %v78_v13 = vpop.permute.xlu0 %77 }
 0x139   :  { %v223_v43 = vmul.f32 %v1861_v41, %v78_v13  ;;  %v783_v13 = vmul.f32 %v1872_v31, %v677_v22  ;;  %v847_v22 = vld [vmem:[%s2242_s2 + $0x40] sm:$0xff] }
 0x13a   :  { %v1875_v60 = vpop.permute.xlu1 %716 }
 0x13b   :  { %v419_v7 = vadd.f32 %v387_v63, %v223_v43  ;;  %752 = vperm.xlu1 %1236, %v1413_v16   ;;  %v391_v16 = vmul.f32 %v1863_v57, %v1673_v25 }
 0x13c   :  { %v1879_v46 = vpop.permute.xlu0 %87 }
 0x13d   :  { %v615_v21 = vadd.f32 %v583_v34, %v419_v7  ;;  %v393_v7 = vmul.f32 %v1863_v57, %v1678_v3 }
 0x13e   :  { %v1884_v23 = vpop.permute.xlu1 %720 }
 0x13f   :  { %1237 = vset.pattern.permute.xlu1 %v2287_v49  ;;  %v1887_v47 = vadd.f32 %v779_v26, %v615_v21  ;;  %v589_v26 = vmul.f32 %v1865_v56, %v1675_v51  ;;  %v395_v51 = vmul.f32 %v1863_v57, %v1685_v6  ;;  %v397_v6 = vmul.f32 %v1863_v57, %v1692_v28 }
 0x140   :  { %998 = vperm.xlu1 %1237, %v864_v32   ;;  %v98_v12 = vpop.permute.xlu0 %97 }
 0x141   :  { %v227_v63 = vmul.f32 %v1861_v41, %v98_v12 }
 0x143   :  { %v423_v43 = vadd.f32 %v391_v16, %v227_v63  ;;  %v1895_v34 = vpop.permute.xlu1 %958 }
 0x144   :  { %1238 = vset.pattern.permute.xlu1 %v2286_v1  ;;  %v108_v15 = vpop.permute.xlu0 %107 }
 0x145   :  { %v229_v35 = vmul.f32 %v1861_v41, %v108_v15  ;;  %684 = vperm.xlu1 %1238, %v1463_v24   ;;  %v619_v25 = vadd.f32 %v587_v59, %v423_v43  ;;  %v591_v24 = vmul.f32 %v1865_v56, %v1681_v8  ;;  %v787_v59 = vmul.f32 %v1872_v31, %v1836_v58  ;;  %v848_v43 = vld [vmem:[%s2242_s2 + $0x48] sm:$0xff] }
 0x146   :  { %v593_v8 = vmul.f32 %v1865_v56, %v1687_v27  ;;  %v791_v27 = vmul.f32 %v1872_v31, %v1763_v42 }
 0x147   :  { %v425_v32 = vadd.f32 %v393_v7, %v229_v35  ;;  %v1907_v21 = vadd.f32 %v783_v13, %v619_v25 }
 0x148   :  { %v1909_v12 = vpop.permute.xlu1 %652  ;;  %v118_v16 = vpop.permute.xlu0 %117 }
 0x149   :  { %v231_v3 = vmul.f32 %v1861_v41, %v118_v16  ;;  %1239 = vset.pattern.permute.xlu1 %v2287_v49  ;;  %v1915_v63 = vadd.f32 %v589_v26, %v425_v32 }
 0x14a   :  { %913 = vperm.xlu1 %1239, %v847_v22   ;;  %v399_v22 = vmul.f32 %v1863_v57, %v1701_v48 }
 0x14b   :  { %v427_v13 = vadd.f32 %v395_v51, %v231_v3  ;;  %v595_v3 = vmul.f32 %v1865_v56, %v1694_v0  ;;  %v865_v0 = vld [vmem:[%s2242_s2 + $0xd0] sm:$0xff] }
 0x14c   :  { %v128_v15 = vpop.permute.xlu0 %127 }
 0x14d   :  { %v233_v7 = vmul.f32 %v1861_v41, %v128_v15  ;;  %v1927_v26 = vpop.permute.xlu1 %873  ;;  %v623_v35 = vadd.f32 %v591_v24, %v427_v13 }
 0x14e   :  { %918 = vperm.xlu1 %1239, %v848_v43  }
 0x14f   :  { %v429_v25 = vadd.f32 %v397_v6, %v233_v7  ;;  %v1931_v58 = vadd.f32 %v787_v59, %v623_v35  ;;  %v866_v6 = vld [vmem:[%s2242_s2 + $0xd8] sm:$0xff]  ;;  %v220_v7 = vmul.f32 %v1861_v41, %v1856_v18  ;;  %v238_v18 = vmul.f32 %v1861_v41, %v1595_v54 }
 0x150   :  { %v138_v32 = vpop.permute.xlu0 %137  ;;  %v580_v54 = vmul.f32 %v1865_v56, %v1645_v11  ;;  %v596_v11 = vmul.f32 %v1865_v56, %v1834_v14 }
 0x151   :  { %v235_v16 = vmul.f32 %v1861_v41, %v138_v32  ;;  %v1936_v51 = vpop.permute.xlu1 %878  ;;  %v1938_v28 = vadd.f32 %v593_v8, %v429_v25  ;;  %v386_v25 = vmul.f32 %v1863_v57, %v1549_v39  ;;  %v236_v32 = vmul.f32 %v1861_v41, %v1589_v52 }
 0x152   :  { %1240 = vset.pattern.permute.xlu1 %v2285_v50  ;;  %v219_v39 = vmul.f32 %v1861_v41, %v1849_v40  ;;  %v402_v52 = vmul.f32 %v1863_v57, %v1597_v55  ;;  %v221_v40 = vmul.f32 %v1861_v41, %v1540_v36  ;;  %v401_v55 = vmul.f32 %v1863_v57, %v1709_v2 }
 0x153   :  { %v431_v24 = vadd.f32 %v399_v22, %v235_v16  ;;  %564 = vperm.xlu1 %1240, %v1420_v17   ;;  %v407_v22 = vmul.f32 %v1863_v57, %v1732_v5  ;;  %v603_v5 = vmul.f32 %v1865_v56, %v1727_v62  ;;  %v411_v36 = vmul.f32 %v1863_v57, %v1750_v29 }
 0x154   :  { %v148_v59 = vpop.permute.xlu0 %147  ;;  %v597_v29 = vmul.f32 %v1865_v56, %v1858_v44 }
 0x155   :  { %v627_v13 = vadd.f32 %v595_v3, %v431_v24  ;;  %v384_v3 = vmul.f32 %v1863_v57, %v1643_v10 }
 0x156   :  { %v1946_v48 = vpop.permute.xlu1 %532 }
 0x157   :  { %1241 = vset.pattern.permute.xlu1 %v2286_v1  ;;  %v1949_v43 = vadd.f32 %v791_v27, %v627_v13  ;;  %v237_v27 = vmul.f32 %v1861_v41, %v148_v59  ;;  %v416_v13 = vadd.f32 %v384_v3, %v220_v7 }
 0x158   :  { %756 = vperm.xlu1 %1241, %v1526_v33   ;;  %v1952_v15 = vpop.permute.xlu0 %157  ;;  %v222_v33 = vmul.f32 %v1861_v41, %v1547_v38  ;;  %v400_v38 = vmul.f32 %v1863_v57, %v1591_v53  ;;  %v383_v53 = vmul.f32 %v1863_v57, %v1542_v37  ;;  %v598_v37 = vmul.f32 %v1865_v56, %v1703_v4 }
 0x159   :  { %v433_v2 = vadd.f32 %v401_v55, %v237_v27  ;;  %v792_v4 = vmul.f32 %v1872_v31, %v1845_v30  ;;  %v385_v30 = vmul.f32 %v1863_v57, %v1649_v19  ;;  %v2314_v27 = vld [vmem:[#allocation44_spill] sm:$0xff] }
 0x15a   :  { %v418_v59 = vadd.f32 %v386_v25, %v222_v33  ;;  %v432_v7 = vadd.f32 %v400_v38, %v236_v32  ;;  %v776_v33 = vmul.f32 %v1872_v31, %v1774_v61  ;;  %v612_v25 = vadd.f32 %v580_v54, %v416_v13 }
 0x15b   :  { %v1957_v42 = vpop.permute.xlu1 %724  ;;  %v582_v32 = vmul.f32 %v1865_v56, %v1792_v20 }
 0x15c   :  { %1242 = vset.pattern.permute.xlu1 %v2287_v49  ;;  %v1960_v17 = vpop.permute.xlu0 %167  ;;  %v808_v13 = vadd.f32 %v776_v33, %v612_v25 }
 0x15d   :  { %1003 = vperm.xlu1 %1242, %v865_v0  }
 0x160   :  { %v1969_v35 = vpop.permute.xlu1 %963  ;;  %v178_v8 = vpop.permute.xlu0 %177 }
 0x161   :  { %v243_v16 = vmul.f32 %v1861_v41, %v178_v8  ;;  %1008 = vperm.xlu1 %1242, %v866_v6   ;;  %v415_v6 = vadd.f32 %v383_v53, %v219_v39  ;;  %v434_v8 = vadd.f32 %v402_v52, %v238_v18  ;;  %v628_v18 = vadd.f32 %v596_v11, %v432_v7  ;;  %v2312_v39 = vld [vmem:[#allocation40_spill] sm:$0xff]  ;;  %v2313_v52 = vld [vmem:[#allocation43_spill] sm:$0xff]  ;;  %v2315_v53 = vld [vmem:[#allocation57_spill] sm:$0xff] }
 0x162   :  { %v607_v20 = vmul.f32 %v1865_v56, %v2312_v39  ;;  %v581_v44 = vmul.f32 %v1865_v56, %v2313_v52  ;;  %v775_v19 = vmul.f32 %v1872_v31, %v2315_v53  ;;  %v793_v11 = vmul.f32 %v1872_v31, %v1875_v60  ;;  %v2316_v60 = vld [vmem:[#allocation7_spill] sm:$0xff]  ;;  %v2318_v52 = vld [vmem:[#allocation20_spill] sm:$0xff] }
 0x163   :  { %v439_v24 = vadd.f32 %v407_v22, %v243_v16  ;;  %v579_v22 = vmul.f32 %v1865_v56, %v1772_v45  ;;  %v794_v45 = vmul.f32 %v1872_v31, %v1884_v23  ;;  %v630_v38 = vadd.f32 %v598_v37, %v434_v8 }
 0x164   :  { %v969_v10 = vpop.permute.xlu1 %968  ;;  %v1995_v0 = vpop.permute.xlu0 %187  ;;  %v824_v54 = vadd.f32 %v792_v4, %v628_v18  ;;  %v614_v37 = vadd.f32 %v582_v32, %v418_v59  ;;  %v777_v4 = vmul.f32 %v1872_v31, %v1909_v12  ;;  %v239_v12 = vmul.f32 %v1861_v41, %v1952_v15 }
 0x165   :  { %1243 = vset.pattern.permute.xlu1 %v2286_v1  ;;  %v2002_v62 = vadd.f32 %v603_v5, %v439_v24  ;;  %v611_v3 = vadd.f32 %v579_v22, %v415_v6  ;;  %v629_v5 = vadd.f32 %v597_v29, %v433_v2  ;;  %v778_v24 = vmul.f32 %v1872_v31, %v2314_v27 }
 0x166   :  { %696 = vperm.xlu1 %1243, %v1364_v9   ;;  %v850_v9 = vld [vmem:[%s2242_s2 + $0x58] sm:$0xff]  ;;  %v826_v6 = vadd.f32 %v794_v45, %v630_v38  ;;  %v1048_v8 = vadd.f32 %v1895_v34, %v824_v54  ;;  %v1032_v2 = vadd.f32 %v1936_v51, %v808_v13  ;;  %v240_v15 = vmul.f32 %v1861_v41, %v2318_v52  ;;  %v2320_v54 = vld [vmem:[#allocation34_spill] sm:$0xff] }
 0x167   :  { %v825_v33 = vadd.f32 %v793_v11, %v629_v5  ;;  %v810_v29 = vadd.f32 %v778_v24, %v614_v37  ;;  %v2317_v38 = vld [vmem:[#allocation35_spill] sm:$0xff]  ;;  %v599_v13 = vmul.f32 %v1865_v56, %v2320_v54  ;;  %v600_v37 = vmul.f32 %v1865_v56, %v1946_v48  ;;  %v2327_v54 = vld [vmem:[#allocation22_spill] sm:$0xff] }
 0x168   :  { %v198_v14 = vpop.permute.xlu0 %197  ;;  %v1050_v25 = vadd.f32 %v969_v10, %v826_v6  ;;  %v1080_v45 = vmax.f32 %v1048_v8, 0.0  ;;  %v403_v18 = vmul.f32 %v1863_v57, %v2317_v38  ;;  %v2321_v8 = vld [vmem:[#allocation5_spill] sm:$0xff] }
 0x169   :  { %v247_v61 = vmul.f32 %v1861_v41, %v198_v14  ;;  %v2027_v16 = vpop.permute.xlu1 %664  ;;  %v417_v14 = vadd.f32 %v385_v30, %v221_v40  ;;  %v1049_v34 = vadd.f32 %v1969_v35, %v825_v33  ;;  %v1064_v40 = vmax.f32 %v1032_v2, 0.0 }
 0x16a   :  { %1244 = vset.pattern.permute.xlu1 %v2287_v49  ;;  %v795_v2 = vmul.f32 %v1872_v31, %v1957_v42 }
 0x16b   :  { %v443_v23 = vadd.f32 %v411_v36, %v247_v61  ;;  %928 = vperm.xlu1 %1244, %v850_v9   ;;  %v807_v36 = vadd.f32 %v775_v19, %v611_v3  ;;  %v613_v32 = vadd.f32 %v581_v44, %v417_v14  ;;  %v1082_v61 = vmax.f32 %v1050_v25, 0.0  ;;  %v2319_v44 = vld [vmem:[#allocation21_spill] sm:$0xff] }
 0x16c   :  { %v2040_v55 = vpop.permute.xlu0 %207  ;;  %v1081_v39 = vmax.f32 %v1049_v34, 0.0  ;;  %v404_v5 = vmul.f32 %v1863_v57, %v2319_v44  ;;  %v868_v14 = vld [vmem:[%s2242_s2 + $0xe8] sm:$0xff] }
 0x16d   :  { %v2044_v7 = vadd.f32 %v607_v20, %v443_v23  ;;  %v1031_v59 = vadd.f32 %v1927_v26, %v807_v36  ;;  %v809_v26 = vadd.f32 %v777_v4, %v613_v32  ;;  %v435_v23 = vadd.f32 %v403_v18, %v239_v12  ;;  %v2322_v4 = vld [vmem:[#allocation45_spill] sm:$0xff]  ;;  %v2324_v12 = vld [vmem:[#allocation8_spill] sm:$0xff]  ;;  %v2326_v18 = vld [vmem:[#allocation46_spill] sm:$0xff] }
 0x16e   :  { %v889_v22 = vpop.permute.xlu1 %888  ;;  %v1105_v24 = vpack.c.bf16 %v1082_v61, %v1081_v39  ;;  %v436_v36 = vadd.f32 %v404_v5, %v240_v15  ;;  %v796_v33 = vmul.f32 %v1872_v31, %v2322_v4  ;;  %v224_v61 = vmul.f32 %v1861_v41, %v2324_v12  ;;  %v2330_v4 = vld [vmem:[#allocation36_spill] sm:$0xff] }
 0x16f   :  { %1245 = vset.pattern.permute.xlu1 %v2285_v50  ;;  %v1034_v10 = vadd.f32 %v889_v22, %v810_v29  ;;  %v1063_v3 = vmax.f32 %v1031_v59, 0.0  ;;  %v631_v22 = vadd.f32 %v599_v13, %v435_v23  ;;  %v2323_v29 = vld [vmem:[#allocation6_spill] sm:$0xff]  ;;  %v780_v39 = vmul.f32 %v1872_v31, %v2027_v16 }
 0x170   :  { %568 = vperm.xlu1 %1245, %v2316_v60   ;;  %v954_v9 = vpop.permute.xlu0 %953  ;;  %v632_v48 = vadd.f32 %v600_v37, %v436_v36  ;;  %v853_v23 = vld [vmem:[%s2242_s2 + $0x70] sm:$0xff]  ;;  %v242_v13 = vmul.f32 %v1861_v41, %v2327_v54  ;;  %v2328_v37 = vld [vmem:[#allocation23_spill] sm:$0xff] }
 0x171   :  { %v1047_v51 = vadd.f32 %v954_v9, %v1949_v43  ;;  %v1096_v27 = vpack.c.bf16 %v1064_v40, %v1063_v3  ;;  %v1066_v53 = vmax.f32 %v1034_v10, 0.0  ;;  %v851_v40 = vld [vmem:[%s2242_s2 + $0x60] sm:$0xff]  ;;  %v2325_v10 = vld [vmem:[#allocation9_spill] sm:$0xff] }
 0x172   :  { %v828_v32 = vadd.f32 %v796_v33, %v632_v48  ;;  %v852_v3 = vld [vmem:[%s2242_s2 + $0x68] sm:$0xff]  ;;  %v602_v33 = vmul.f32 %v1865_v56, %v2330_v4 }
 0x173   :  { %v1079_v30 = vmax.f32 %v1047_v51, 0.0  ;;  %v2057_v50 = vpop.permute.xlu1 %536 }
 0x174   :  { %1247 = vset.pattern.permute.xlu1 %v2286_v1  ;;  %v884_v35 = vpop.permute.xlu0 %883 }
 0x175   :  { %v1033_v43 = vadd.f32 %v884_v35, %v809_v26  ;;  %764 = vperm.xlu1 %1247, %v2316_v60   ;;  %v1104_v20 = vpack.c.bf16 %v1080_v45, %v1079_v30  ;;  %v827_v60 = vadd.f32 %v795_v2, %v631_v22  ;;  %v388_v30 = vmul.f32 %v1863_v57, %v2325_v10  ;;  %v2334_v10 = vld [vmem:[#allocation32_spill] sm:$0xff] }
 0x176   :  { %v601_v2 = vmul.f32 %v1865_v56, %v2057_v50  ;;  %v225_v50 = vmul.f32 %v1861_v41, %v1879_v46 }
 0x177   :  { %v1065_v19 = vmax.f32 %v1033_v43, 0.0  ;;  %1182 = vmatprep.subr.bf16.mxu0 %v1104_v20  ;;  %v420_v35 = vadd.f32 %v388_v30, %v224_v61  ;;  %v2333_v61 = vld [vmem:[#allocation11_spill] sm:$0xff]  ;;  %v585_v30 = vmul.f32 %v1865_v56, %v2334_v10  ;;  %v2340_v10 = vld [vmem:[#allocation12_spill] sm:$0xff] }
 0x178   :  { %v2071_v11 = vpop.permute.xlu1 %732  ;;  %1183 = vmatpush3.bf16.msra.mxu0 %v1096_v27  ;;  %v974_v59 = vpop.permute.xlu0 %973 }
 0x179   :  { %v1097_v6 = vpack.c.bf16 %v1066_v53, %v1065_v19  ;;  %768 = vperm.xlu1 %1247, %v2321_v8   ;;  %1184 = vmatprep.subr.bf16.mxu0 %v1105_v24  ;;  %v1051_v9 = vadd.f32 %v974_v59, %v827_v60  ;;  %v1112_v19 = vld [vmem:[%s2244_s4] sm:$0xff]  ;;  %v2329_v8 = vld [vmem:[#allocation37_spill] sm:$0xff]  ;;  %v797_v59 = vmul.f32 %v1872_v31, %v2071_v11 }
 0x17a   :  { %v405_v36 = vmul.f32 %v1863_v57, %v2329_v8  ;;  %v390_v11 = vmul.f32 %v1863_v57, %v2333_v61 }
 0x17b   :  { %v1083_v51 = vmax.f32 %v1051_v9, 0.0 }
 0x17c   :  { %v737_v25 = vpop.permute.xlu1 %736  ;;  %1185 = vmatpush3.bf16.msra.mxu0 %v1097_v6  ;;  %v406_v6 = vmul.f32 %v1863_v57, %v2328_v37 }
 0x17d   :  { %1248 = vset.pattern.permute.xlu1 %v2287_v49 }
 0x17e   :  { %1018 = vperm.xlu1 %1248, %v868_v14   ;;  %v2122_v14 = vld [vmem:[%s2243_s3] sm:$0xff]  ;;  %v438_v60 = vadd.f32 %v406_v6, %v242_v13  ;;  %s1282_s3 = smov [#allocation2]  }
 0x17f   :  { %s1172_s21 = sshll.u32 %s1282_s3, 4  ;;  %s1173_s21 = int_to_ptr.vmem [resolvable:$true] %s1172_s21 }
 0x180   :  { %s1254_s22 = scalar_lea.vmem %s1173_s21, 128  ;;  %p1259_p1 = scmp.lt.s32.totalorder %s1173_s21, %s1173_s21 }
 0x181   :  { %v979_v34 = vpop.permute.xlu1 %978  ;;  %p1255_p0 = scmp.ne.s32.totalorder %s1173_s21, %s1254_s22  ;;  %p1260_p2 = scmp.lt.s32.totalorder %s1254_s22, %s1254_s22 }
 0x182   :  { %v1052_v42 = vadd.f32 %v979_v34, %v828_v32  ;;  %1249 = vset.pattern.permute.xlu1 %v2286_v1  ;;  %v584_v1 = vmul.f32 %v1865_v56, %v2326_v18  ;;  %v798_v32 = vmul.f32 %v1872_v31, %v737_v25  ;;  %v2335_v25 = vld [vmem:[#allocation47_spill] sm:$0xff] }
 0x183   :  { %700 = vperm.xlu1 %1249, %v2323_v29   ;;  %p1261_p3 = por %p1260_p2, %p1259_p1 }
 0x184   :  { %v1084_v45 = vmax.f32 %v1052_v42, 0.0  ;;  %v616_v20 = vadd.f32 %v584_v1, %v420_v35  ;;  %v2331_v42 = vld [vmem:[#allocation33_spill] sm:$0xff] }
 0x185   :  { %v389_v29 = vmul.f32 %v1863_v57, %v2331_v42  ;;  %p1262_p4 = pnand %p1261_p3, %p1255_p0 }
 0x186   :  { %v1106_v26 = vpack.c.bf16 %v1084_v45, %v1083_v51  ;;  %v669_v38 = vpop.permute.xlu1 %668  ;;  %v812_v15 = vadd.f32 %v780_v39, %v616_v20  ;;  %v634_v51 = vadd.f32 %v602_v33, %v438_v60 }
 0x187   :  { %1251 = vset.pattern.permute.xlu1 %v2287_v49  ;;  %v870_v49 = vld [vmem:[%s2242_s2 + $0xf8] sm:$0xff]  ;;  %v781_v35 = vmul.f32 %v1872_v31, %v669_v38 }
 0x188   :  { %933 = vperm.xlu1 %1251, %v851_v40   ;;  %1186 = vmatprep.subr.bf16.mxu0 %v1106_v26  ;;  %v2332_v40 = vld [vmem:[#allocation10_spill] sm:$0xff]  ;;  %v421_v26 = vadd.f32 %v389_v29, %v225_v50  ;;  %v830_v18 = vadd.f32 %v798_v32, %v634_v51 }
 0x189   :  { %v226_v12 = vmul.f32 %v1861_v41, %v2332_v40 }
 0x18a   :  { %v617_v20 = vadd.f32 %v585_v30, %v421_v26 }
 0x18b   :  { %v894_v43 = vpop.permute.xlu1 %893 }
 0x18c   :  { %938 = vperm.xlu1 %1251, %v852_v3   ;;  %v1035_v52 = vadd.f32 %v894_v43, %v1887_v47  ;;  %v241_v47 = vmul.f32 %v1861_v41, %v1960_v17  ;;  %v1181_v17 = vcombine.high %v2122_v14, %v2122_v14  ;;  %v586_v3 = vmul.f32 %v1865_v56, %v2335_v25 }
 0x18d   :  { %v422_v43 = vadd.f32 %v390_v11, %v226_v12 }
 0x18e   :  { %v1067_v27 = vmax.f32 %v1035_v52, 0.0  ;;  %v437_v48 = vadd.f32 %v405_v36, %v241_v47  ;;  %1157 = vmatprep.mubr.bf16.mxu0 %v1181_v17  ;;  %v2337_v36 = vld [vmem:[#allocation24_spill] sm:$0xff]  ;;  %v2338_v17 = vld [vmem:[#allocation25_spill] sm:$0xff] }
 0x18f   :  { %v899_v44 = vpop.permute.xlu1 %898  ;;  %v408_v4 = vmul.f32 %v1863_v57, %v2338_v17 }
 0x190   :  { %v1036_v5 = vadd.f32 %v899_v44, %v812_v15  ;;  %1028 = vperm.xlu1 %1251, %v870_v49   ;;  %v633_v9 = vadd.f32 %v601_v2, %v437_v48  ;;  %v618_v15 = vadd.f32 %v586_v3, %v422_v43  ;;  %v2336_v44 = vld [vmem:[#allocation48_spill] sm:$0xff]  ;;  %v244_v2 = vmul.f32 %v1861_v41, %v2337_v36 }
 0x192   :  { %v1068_v24 = vmax.f32 %v1036_v5, 0.0  ;;  %v829_v45 = vadd.f32 %v797_v59, %v633_v9  ;;  %v782_v5 = vmul.f32 %v1872_v31, %v2336_v44  ;;  %v440_v60 = vadd.f32 %v408_v4, %v244_v2 }
 0x194   :  { %v1098_v16 = vpack.c.bf16 %v1068_v24, %v1067_v27  ;;  %943 = vperm.xlu1 %1251, %v853_v23   ;;  %v549_v53 = vpop.permute.xlu1 %548  ;;  %v813_v23 = vadd.f32 %v781_v35, %v617_v20  ;;  %v814_v47 = vadd.f32 %v782_v5, %v618_v15 }
 0x195   :  { %v604_v33 = vmul.f32 %v1865_v56, %v549_v53  ;;  %v228_v53 = vmul.f32 %v1861_v41, %v2340_v10 }
 0x196   :  { %1187 = vmatpush3.bf16.msra.mxu0 %v1098_v16  ;;  %v904_v16 = vpop.permute.xlu0 %903 }
 0x197   :  { %v636_v50 = vadd.f32 %v604_v33, %v440_v60 }
 0x198   :  { %1115 = vperm.xlu1 %1251, %v1112_v19   ;;  %v1037_v19 = vadd.f32 %v904_v16, %v813_v23  ;;  %v245_v23 = vmul.f32 %v1861_v41, %v1995_v0 }
 0x199   :  { %v741_v22 = vpop.permute.xlu1 %740 }
 0x19a   :  { %v1069_v37 = vmax.f32 %v1037_v19, 0.0  ;;  %v799_v48 = vmul.f32 %v1872_v31, %v741_v22  ;;  %v994_v29 = vpop.permute.xlu0 %993  ;;  %v2341_v22 = vld [vmem:[#allocation13_spill] sm:$0xff]  ;;  %v2344_v19 = vld [vmem:[#allocation27_spill] sm:$0xff] }
 0x19b   :  { %v392_v30 = vmul.f32 %v1863_v57, %v2341_v22 }
 0x19c   :  { %v831_v9 = vadd.f32 %v799_v48, %v2002_v62  ;;  %v2342_v62 = vld [vmem:[#allocation49_spill] sm:$0xff] }
 0x19e   :  { %v984_v34 = vpop.permute.xlu1 %983  ;;  %v1055_v51 = vadd.f32 %v994_v29, %v831_v9 }
 0x19f   :  { %v1053_v46 = vadd.f32 %v984_v34, %v829_v45  ;;  %v2339_v34 = vld [vmem:[#allocation50_spill] sm:$0xff] }
 0x1a0   :  { %v800_v42 = vmul.f32 %v1872_v31, %v2339_v34  ;;  %v1087_v61 = vmax.f32 %v1055_v51, 0.0  ;;  %v2347_v34 = vld [vmem:[#allocation14_spill] sm:$0xff] }
 0x1a1   :  { %v1085_v49 = vmax.f32 %v1053_v46, 0.0 }
 0x1a2   :  { %v989_v1 = vpop.permute.xlu1 %988  ;;  %v832_v45 = vadd.f32 %v800_v42, %v636_v50  ;;  %v2348_v42 = vld [vmem:[#allocation15_spill] sm:$0xff] }
 0x1a3   :  { %v1054_v39 = vadd.f32 %v989_v1, %v830_v18  ;;  %v588_v18 = vmul.f32 %v1865_v56, %v2342_v62  ;;  %v424_v1 = vadd.f32 %v392_v30, %v228_v53  ;;  %v394_v29 = vmul.f32 %v1863_v57, %v2348_v42  ;;  %v924_v62 = vpop.permute.xlu0 %923 }
 0x1a5   :  { %v1086_v52 = vmax.f32 %v1054_v39, 0.0  ;;  %v620_v35 = vadd.f32 %v588_v18, %v424_v1 }
 0x1a7   :  { %v1107_v27 = vpack.c.bf16 %v1086_v52, %v1085_v49  ;;  %v681_v24 = vpop.permute.xlu1 %680 }
 0x1a8   :  { %v784_v25 = vmul.f32 %v1872_v31, %v681_v24  ;;  %v410_v24 = vmul.f32 %v1863_v57, %v2344_v19 }
 0x1a9   :  { %1188 = vmatprep.subr.bf16.mxu0 %v1107_v27  ;;  %v2343_v27 = vld [vmem:[#allocation26_spill] sm:$0xff] }
 0x1aa   :  { %v816_v43 = vadd.f32 %v784_v25, %v620_v35  ;;  %v246_v16 = vmul.f32 %v1861_v41, %v2343_v27 }
 0x1ac   :  { %v909_v54 = vpop.permute.xlu1 %908  ;;  %v442_v2 = vadd.f32 %v410_v24, %v246_v16 }
 0x1ad   :  { %v1038_v13 = vadd.f32 %v909_v54, %v814_v47  ;;  %v2345_v47 = vld [vmem:[#allocation39_spill] sm:$0xff] }
 0x1af   :  { %v1070_v38 = vmax.f32 %v1038_v13, 0.0 }
 0x1b1   :  { %v1099_v6 = vpack.c.bf16 %v1070_v38, %v1069_v37  ;;  %v553_v8 = vpop.permute.xlu1 %552  ;;  %v2346_v37 = vld [vmem:[#allocation38_spill] sm:$0xff] }
 0x1b2   :  { %v605_v54 = vmul.f32 %v1865_v56, %v553_v8  ;;  %v606_v38 = vmul.f32 %v1865_v56, %v2346_v37  ;;  %v230_v8 = vmul.f32 %v1861_v41, %v2347_v34  ;;  %v2357_v34 = vld [vmem:[#allocation52_spill] sm:$0xff] }
 0x1b3   :  { %1189 = vmatpush3.bf16.msra.mxu0 %v1099_v6 }
 0x1b4   :  { %v638_v33 = vadd.f32 %v606_v38, %v442_v2 }
 0x1b6   :  { %v749_v59 = vpop.permute.xlu1 %748 }
 0x1b7   :  { %v801_v36 = vmul.f32 %v1872_v31, %v749_v59  ;;  %v2349_v59 = vld [vmem:[#allocation51_spill] sm:$0xff] }
 0x1ba   :  { %v753_v32 = vpop.permute.xlu1 %752 }
 0x1bb   :  { %v802_v17 = vmul.f32 %v1872_v31, %v753_v32 }
 0x1bd   :  { %v834_v50 = vadd.f32 %v802_v17, %v638_v33 }
 0x1bf   :  { %v999_v40 = vpop.permute.xlu1 %998 }
 0x1c0   :  { %v1056_v12 = vadd.f32 %v999_v40, %v832_v45  ;;  %v590_v40 = vmul.f32 %v1865_v56, %v2349_v59  ;;  %v2359_v59 = vld [vmem:[#allocation31_spill] sm:$0xff] }
 0x1c2   :  { %v1088_v11 = vmax.f32 %v1056_v12, 0.0 }
 0x1c4   :  { %v1108_v26 = vpack.c.bf16 %v1088_v11, %v1087_v61  ;;  %v685_v46 = vpop.permute.xlu1 %684  ;;  %v426_v61 = vadd.f32 %v394_v29, %v230_v8  ;;  %v2350_v11 = vld [vmem:[#allocation53_spill] sm:$0xff]  ;;  %v592_v8 = vmul.f32 %v1865_v56, %v2357_v34 }
 0x1c5   :  { %v785_v51 = vmul.f32 %v1872_v31, %v685_v46  ;;  %v786_v10 = vmul.f32 %v1872_v31, %v2350_v11  ;;  %v2361_v11 = vld [vmem:[#allocation19_spill] sm:$0xff] }
 0x1c6   :  { %1190 = vmatprep.subr.bf16.mxu0 %v1108_v26  ;;  %v622_v26 = vadd.f32 %v590_v40, %v426_v61  ;;  %v414_v40 = vmul.f32 %v1863_v57, %v2359_v59 }
 0x1c7   :  { %v817_v53 = vadd.f32 %v785_v51, %v1915_v63  ;;  %v2358_v51 = vld [vmem:[#allocation30_spill] sm:$0xff] }
 0x1c8   :  { %v818_v1 = vadd.f32 %v786_v10, %v622_v26  ;;  %v398_v10 = vmul.f32 %v1863_v57, %v2361_v11  ;;  %v2362_v26 = vld [vmem:[#allocation41_spill] sm:$0xff] }
 0x1c9   :  { %v914_v3 = vpop.permute.xlu1 %913  ;;  %v1041_v18 = vadd.f32 %v924_v62, %v817_v53  ;;  %v610_v62 = vmul.f32 %v1865_v56, %v2362_v26 }
 0x1ca   :  { %v1039_v39 = vadd.f32 %v914_v3, %v1907_v21  ;;  %v409_v21 = vmul.f32 %v1863_v57, %v2345_v47  ;;  %v2353_v47 = vld [vmem:[#allocation55_spill] sm:$0xff] }
 0x1cb   :  { %v1073_v3 = vmax.f32 %v1041_v18, 0.0 }
 0x1cc   :  { %v1071_v52 = vmax.f32 %v1039_v39, 0.0  ;;  %v441_v6 = vadd.f32 %v409_v21, %v245_v23  ;;  %v804_v21 = vmul.f32 %v1872_v31, %v2353_v47 }
 0x1cd   :  { %v919_v20 = vpop.permute.xlu1 %918 }
 0x1ce   :  { %v1040_v49 = vadd.f32 %v919_v20, %v816_v43  ;;  %v637_v0 = vadd.f32 %v605_v54, %v441_v6  ;;  %v2351_v20 = vld [vmem:[#allocation28_spill] sm:$0xff]  ;;  %v1014_v54 = vpop.permute.xlu0 %1013 }
 0x1d0   :  { %v1072_v15 = vmax.f32 %v1040_v49, 0.0  ;;  %v833_v48 = vadd.f32 %v801_v36, %v637_v0  ;;  %v248_v49 = vmul.f32 %v1861_v41, %v2351_v20 }
 0x1d2   :  { %v1100_v44 = vpack.c.bf16 %v1072_v15, %v1071_v52  ;;  %v565_v5 = vpop.permute.xlu1 %564  ;;  %v2352_v52 = vld [vmem:[#allocation29_spill] sm:$0xff] }
 0x1d3   :  { %v412_v63 = vmul.f32 %v1863_v57, %v2352_v52  ;;  %v608_v15 = vmul.f32 %v1865_v56, %v565_v5  ;;  %v249_v5 = vmul.f32 %v1861_v41, %v2040_v55 }
 0x1d4   :  { %1191 = vmatpush3.bf16.msra.mxu0 %v1100_v44 }
 0x1d5   :  { %v444_v27 = vadd.f32 %v412_v63, %v248_v49  ;;  %v2364_v49 = vld [vmem:[#allocation56_spill] sm:$0xff] }
 0x1d6   :  { %v790_v52 = vmul.f32 %v1872_v31, %v2364_v49 }
 0x1d7   :  { %v757_v13 = vpop.permute.xlu1 %756  ;;  %v640_v16 = vadd.f32 %v608_v15, %v444_v27 }
 0x1d8   :  { %v803_v44 = vmul.f32 %v1872_v31, %v757_v13  ;;  %v2354_v13 = vld [vmem:[#allocation16_spill] sm:$0xff] }
 0x1d9   :  { %v836_v38 = vadd.f32 %v804_v21, %v640_v16  ;;  %v232_v17 = vmul.f32 %v1861_v41, %v2354_v13 }
 0x1da   :  { %v835_v19 = vadd.f32 %v803_v44, %v2044_v7 }
 0x1dc   :  { %v1004_v4 = vpop.permute.xlu1 %1003  ;;  %v1059_v37 = vadd.f32 %v1014_v54, %v835_v19 }
 0x1dd   :  { %v1057_v60 = vadd.f32 %v1004_v4, %v833_v48  ;;  %v2355_v4 = vld [vmem:[#allocation17_spill] sm:$0xff] }
 0x1de   :  { %v1091_v2 = vmax.f32 %v1059_v37, 0.0  ;;  %v396_v7 = vmul.f32 %v1863_v57, %v2355_v4 }
 0x1df   :  { %v1089_v12 = vmax.f32 %v1057_v60, 0.0  ;;  %v2356_v60 = vld [vmem:[#allocation42_spill] sm:$0xff] }
 0x1e0   :  { %v1009_v9 = vpop.permute.xlu1 %1008  ;;  %v428_v29 = vadd.f32 %v396_v7, %v232_v17  ;;  %v1180_v17 = vcombine.low %v2122_v14, %v2122_v14 }
 0x1e1   :  { %v1058_v45 = vadd.f32 %v1009_v9, %v834_v50  ;;  %v413_v50 = vmul.f32 %v1863_v57, %v2356_v60 }
 0x1e2   :  { %v624_v18 = vadd.f32 %v592_v8, %v428_v29 }
 0x1e3   :  { %v1090_v32 = vmax.f32 %v1058_v45, 0.0  ;;  %v445_v42 = vadd.f32 %v413_v50, %v249_v5  ;;  %v250_v45 = vmul.f32 %v1861_v41, %v2358_v51 }
 0x1e5   :  { %v1109_v22 = vpack.c.bf16 %v1090_v32, %v1089_v12  ;;  %v697_v30 = vpop.permute.xlu1 %696  ;;  %v2360_v32 = vld [vmem:[#allocation18_spill] sm:$0xff] }
 0x1e6   :  { %v788_v12 = vmul.f32 %v1872_v31, %v697_v30  ;;  %v234_v61 = vmul.f32 %v1861_v41, %v2360_v32 }
 0x1e7   :  { %1192 = vmatprep.subr.bf16.mxu0 %v1109_v22 }
 0x1e8   :  { %v820_v41 = vadd.f32 %v788_v12, %v624_v18 }
 0x1ea   :  { %v929_v46 = vpop.permute.xlu1 %928 }
 0x1eb   :  { %v1042_v25 = vadd.f32 %v929_v46, %v818_v1  ;;  %v2363_v1 = vld [vmem:[#allocation54_spill] sm:$0xff] }
 0x1ec   :  { %v594_v46 = vmul.f32 %v1865_v56, %v2363_v1 }
 0x1ed   :  { %v1074_v35 = vmax.f32 %v1042_v25, 0.0  ;;  %v1024_v25 = vpop.permute.xlu0 %1023 }
 0x1ef   :  { %v1101_v39 = vpack.c.bf16 %v1074_v35, %v1073_v3  ;;  %v569_v43 = vpop.permute.xlu1 %568  ;;  %v446_v35 = vadd.f32 %v414_v40, %v250_v45 }
 0x1f0   :  { %v609_v9 = vmul.f32 %v1865_v56, %v569_v43  ;;  %v430_v43 = vadd.f32 %v398_v10, %v234_v61 }
 0x1f1   :  { %1193 = vmatpush3.bf16.msra.mxu0 %v1101_v39  ;;  %v642_v57 = vadd.f32 %v610_v62, %v446_v35  ;;  %v949_v19 = vpop.permute.xlu0 %948 }
 0x1f2   :  { %v641_v53 = vadd.f32 %v609_v9, %v445_v42  ;;  %v626_v15 = vadd.f32 %v594_v46, %v430_v43 }
 0x1f4   :  { %v765_v23 = vpop.permute.xlu1 %764 }
 0x1f5   :  { %v805_v55 = vmul.f32 %v1872_v31, %v765_v23 }
 0x1f7   :  { %v837_v3 = vadd.f32 %v805_v55, %v641_v53 }
 0x1f8   :  { %v769_v24 = vpop.permute.xlu1 %768 }
 0x1f9   :  { %v806_v30 = vmul.f32 %v1872_v31, %v769_v24  ;;  %v1061_v44 = vadd.f32 %v1024_v25, %v837_v3  ;;  %v822_v24 = vadd.f32 %v790_v52, %v626_v15 }
 0x1fb   :  { %v838_v16 = vadd.f32 %v806_v30, %v642_v57  ;;  %v1046_v54 = vadd.f32 %v949_v19, %v822_v24  ;;  %v1093_v37 = vmax.f32 %v1061_v44, 0.0 }
 0x1fd   :  { %v1019_v6 = vpop.permute.xlu1 %1018  ;;  %v1078_v5 = vmax.f32 %v1046_v54, 0.0 }
 0x1fe   :  { %v1060_v36 = vadd.f32 %v1019_v6, %v836_v38 }
 0x200   :  { %v1092_v0 = vmax.f32 %v1060_v36, 0.0 }
 0x202   :  { %v1110_v33 = vpack.c.bf16 %v1092_v0, %v1091_v2  ;;  %v701_v48 = vpop.permute.xlu1 %700 }
 0x203   :  { %v789_v23 = vmul.f32 %v1872_v31, %v701_v48 }
 0x204   :  { %1194 = vmatprep.subr.bf16.mxu0 %v1110_v33 }
 0x205   :  { %v821_v6 = vadd.f32 %v789_v23, %v1938_v28 }
 0x207   :  { %v934_v22 = vpop.permute.xlu1 %933 }
 0x208   :  { %v1043_v39 = vadd.f32 %v934_v22, %v1931_v58 }
 0x20a   :  { %v1075_v56 = vmax.f32 %v1043_v39, 0.0 }
 0x20b   :  { %v939_v20 = vpop.permute.xlu1 %938 }
 0x20c   :  { %v1044_v63 = vadd.f32 %v939_v20, %v820_v41 }
 0x20e   :  { %v1076_v27 = vmax.f32 %v1044_v63, 0.0 }
 0x20f   :  { %v1029_v47 = vpop.permute.xlu1 %1028 }
 0x210   :  { %v1102_v21 = vpack.c.bf16 %v1076_v27, %v1075_v56  ;;  %v1062_v58 = vadd.f32 %v1029_v47, %v838_v16 }
 0x212   :  { %v1094_v38 = vmax.f32 %v1062_v58, 0.0  ;;  %1195 = vmatpush3.bf16.msra.mxu0 %v1102_v21 }
 0x213   :  { %v944_v36 = vpop.permute.xlu1 %943 }
 0x214   :  { %v1111_v2 = vpack.c.bf16 %v1094_v38, %v1093_v37  ;;  %v1045_v0 = vadd.f32 %v944_v36, %v821_v6 }
 0x216   :  { %v1077_v13 = vmax.f32 %v1045_v0, 0.0  ;;  %1196 = vmatprep.subr.bf16.mxu0 %v1111_v2 }
 0x217   :  { %v1116_v60 = vpop.permute.xlu1 %1115 }
 0x218   :  { %v1103_v31 = vpack.c.bf16 %v1078_v5, %v1077_v13 }
 0x21a   :  { %1197 = vmatpush3.bf16.msra.mxu0 %v1103_v31 }
 0x21d   :  { %1158 = vmatmul.mubr.bf16.vlgmr.msra.gmra.mrb[0].mxu0 %v1180_v17 }
 0x2f0   :  { %v1198_v4 = vpop.f32.mrb[0].mxu0 }
 0x2f1   :  { %v1199_v7 = vpop.f32.mrb[1].mxu0 }
 0x2f2   :  { %v1200_v33 = vadd.f32 %v1199_v7, %v1198_v4  ;;  %v1201_v48 = vpop.f32.mrb[2].mxu0 }
 0x2f3   :  { %v1202_v28 = vpop.f32.mrb[3].mxu0 }
 0x2f4   :  { %v1160_v50 = vadd.f32 %v1200_v33, %v1116_v60 }
 0x2f6   :  { %1165 = vst [vmem:[#allocation2] sm:$0xff] %v1160_v50 }
 0x2f7   :  { %1265 = shalt.err (!%p1262_p4)
}
 0x2f8   :  { %s1266_s24 = scalar_lea.hbm %s2245_s5, 128 }
 0x2f9   :  { %p1267_p5 = scmp.ne.s32.totalorder %s2245_s5, %s1266_s24  ;;  %p1270_p6 = scmp.lt.u32.totalorder %s1266_s24, %s2245_s5 }
 0x2fb   :  { %p1272_p7 = pnand %p1270_p6, %p1267_p5 }
 0x2fd   :  { %1275 = shalt.err (!%p1272_p7)
}
 0x2fe   :  { %1175 = dma.vmem_to_hbm [thread:$0]  %s1173_s21, 128, %s2245_s5, [#allocation3]  }
 0x2ff   :  { %1276 = dma.done.wait [#allocation3], 128  }
 0x300   :  { %1277 = vsyncadd [#allocation3], 4294967168 }
 0x301   :  { %1179 = vsyncpa [#allocation3], 1 }

</bundles_post_ra>
